<compile_context>
chip_gen: v7x
topology: tpu7x:2x2x1
jax: 0.10.0
libtpu: 0.0.40
codegen_flags: <defaults>
</compile_context>

<pallas_src>
import math

import jax
import jax.numpy as jnp
from jax.experimental import pallas as pl
from jax.experimental.pallas import tpu as pltpu


_GELU_C = math.sqrt(2.0 / math.pi)


def _gelu_tanh(h):
    # 0.5*h*(1+tanh(c*(h+0.044715*h^3))) == h*(0.5+0.5*tanh(c*h*(1+0.044715*h^2)))
    # tanh runs on the EUP, multiplies on the VPU -- both hide under the MXU.
    return h * (0.5 + 0.5 * jnp.tanh(jnp.float32(_GELU_C) * h * (1.0 + 0.044715 * (h * h))))


# ---------------------------------------------------------------------------
# Kernel A: fully-resident bf16 weights, grid = (row tiles,)
# ---------------------------------------------------------------------------
def _mlp_kernel_resident(x_ref, w1_ref, b1_ref, w2_ref, b2_ref, o_ref):
    # x cast to bf16 in-kernel (free under the MXU; no wrapper-side HBM sweep).
    x = x_ref[...].astype(w1_ref.dtype)
    h = jnp.dot(x, w1_ref[...], preferred_element_type=jnp.float32) + b1_ref[...]
    h = _gelu_tanh(h)
    # Dropout -> identity (eval mode).
    y = jnp.dot(h.astype(w2_ref.dtype), w2_ref[...],
                preferred_element_type=jnp.float32) + b2_ref[...]
    o_ref[...] = y.astype(o_ref.dtype)


# ---------------------------------------------------------------------------
# Kernel B: H-tiled reduction, grid = (row tiles, hidden tiles)
# ---------------------------------------------------------------------------
def _mlp_kernel_htiled(x_ref, w1_ref, b1_ref, w2_ref, b2_ref, o_ref, acc_ref):
    hj = pl.program_id(1)

    @pl.when(hj == 0)
    def _():
        acc_ref[...] = jnp.zeros_like(acc_ref)

    x = x_ref[...].astype(w1_ref.dtype)
    h = jnp.dot(x, w1_ref[...], preferred_element_type=jnp.float32) + b1_ref[...]
    h = _gelu_tanh(h)
    acc_ref[...] += jnp.dot(h.astype(w2_ref.dtype), w2_ref[...],
                            preferred_element_type=jnp.float32)

    @pl.when(hj == pl.num_programs(1) - 1)
    def _():
        o_ref[...] = (acc_ref[...] + b2_ref[...]).astype(o_ref.dtype)


# ---------------------------------------------------------------------------
# Sizing helpers
# ---------------------------------------------------------------------------
def _round_up(n, m):
    return ((n + m - 1) // m) * m


def _choose_tm(M):
    # Big row tiles amortize per-step overhead; keep >= 2 grid steps when M
    # allows so the "parallel" row axis can feed both v7x TensorCores.
    for cand in (512, 256, 128):
        if M >= 2 * cand:
            return cand
    if M > 128:
        return _round_up(-(-M // 2), 8)   # two steps
    return max(8, _round_up(M, 8))        # single step


def _vmem_budget_bytes():
    # Generation-aware budget: physical per-core VMEM minus headroom for
    # Mosaic internal scratch.  v7x: 64 MiB -> ~56 MiB; v5e/v6e: 128 -> ~112.
    try:
        cap = int(pltpu.get_tpu_info().vmem_capacity_bytes)
    except Exception:  # pragma: no cover - conservative fallback
        cap = 64 << 20
    return cap - max(8 << 20, cap // 8)


def _need_resident(tm, D, H, x_bytes, out_bytes):
    weights = 2 * D * H * 2 + (H + D) * 4                 # bf16 W1+W2 (single buf) + f32 biases
    io = 2 * tm * D * x_bytes + 2 * tm * D * out_bytes    # double-buffered x / out tiles
    scratch = 2 * tm * H * 4                              # f32 h + cast temp headroom
    return weights + io + scratch


def _need_htiled(tm, th, D, x_bytes, out_bytes):
    weights = 2 * (D * th * 2 + th * D * 2) + 2 * th * 4 + D * 4   # double-buffered W1/W2 tiles
    io = 2 * tm * D * x_bytes + 2 * tm * D * out_bytes
    acc = tm * D * 4
    scratch = 2 * tm * th * 4
    return weights + io + acc + scratch


# ---------------------------------------------------------------------------
# Wrapper
# ---------------------------------------------------------------------------
def mlp_block1(x, w1, b1, w2, b2, *, tm=None, th=None, out_dtype=None,
               vmem_limit_bytes=None, force_h_tiling=False):
    """x: [..., D]; w1: [D, H] (ideally bf16); b1: [H]; w2: [H, D]; b2: [D]."""
    orig_shape = x.shape
    D = orig_shape[-1]
    H = w1.shape[-1]
    out_dtype = x.dtype if out_dtype is None else out_dtype
    x_bytes = jnp.dtype(x.dtype).itemsize
    out_bytes = jnp.dtype(out_dtype).itemsize

    # Weights should already be bf16 (convert once at init); casting here is a
    # per-call fallback that costs an extra HBM sweep.
    w1 = w1 if w1.dtype == jnp.bfloat16 else w1.astype(jnp.bfloat16)
    w2 = w2 if w2.dtype == jnp.bfloat16 else w2.astype(jnp.bfloat16)
    b1_2d = b1.reshape(1, H).astype(jnp.float32)
    b2_2d = b2.reshape(1, D).astype(jnp.float32)

    x2d = x.reshape(-1, D)
    M = x2d.shape[0]

    if tm is None:
        tm = _choose_tm(M)
    assert tm % 8 == 0, "row tile must be a sublane multiple"
    grid_m = pl.cdiv(M, tm)

    budget = _vmem_budget_bytes()
    need_res = _need_resident(tm, D, H, x_bytes, out_bytes)
    use_h_tiling = force_h_tiling or need_res > budget

    chosen_th = None
    if use_h_tiling:
        if th is not None:
            chosen_th = th
        else:
            cands = [t for t in range(128, H + 1, 128) if H % t == 0]
            for t in sorted(cands, reverse=True):
                if _need_htiled(tm, t, D, x_bytes, out_bytes) <= budget:
                    chosen_th = t
                    break
            if chosen_th is None and cands:
                chosen_th = cands[0]
        if chosen_th is None or H % chosen_th != 0 or \
                (chosen_th % 128 != 0 and chosen_th != H):
            # TODO(synk): cannot H-tile cleanly (H not a 128-multiple); fall
            # back to the resident path and let the compiler do its best.
            chosen_th = None
            use_h_tiling = False

    if use_h_tiling:
        need = _need_htiled(tm, chosen_th, D, x_bytes, out_bytes)
        grid = (grid_m, H // chosen_th)
        kernel = _mlp_kernel_htiled
        in_specs = [
            pl.BlockSpec((tm, D), lambda i, j: (i, 0)),
            pl.BlockSpec((D, chosen_th), lambda i, j: (0, j)),
            pl.BlockSpec((1, chosen_th), lambda i, j: (0, j)),
            pl.BlockSpec((chosen_th, D), lambda i, j: (j, 0)),
            pl.BlockSpec((1, D), lambda i, j: (0, 0),
                         pipeline_mode=pl.Buffered(1)),
        ]
        out_specs = pl.BlockSpec((tm, D), lambda i, j: (i, 0))
        scratch_shapes = [pltpu.VMEM((tm, D), jnp.float32)]
        dims = ("parallel", "arbitrary")
        weight_stream_bytes = grid_m * 2 * D * H * 2
    else:
        need = need_res
        grid = (grid_m,)
        kernel = _mlp_kernel_resident
        in_specs = [
            pl.BlockSpec((tm, D), lambda i: (i, 0)),
            # Weights / biases: constant index_map -> resident, single buffer.
            pl.BlockSpec((D, H), lambda i: (0, 0), pipeline_mode=pl.Buffered(1)),
            pl.BlockSpec((1, H), lambda i: (0, 0), pipeline_mode=pl.Buffered(1)),
            pl.BlockSpec((H, D), lambda i: (0, 0), pipeline_mode=pl.Buffered(1)),
            pl.BlockSpec((1, D), lambda i: (0, 0), pipeline_mode=pl.Buffered(1)),
        ]
        out_specs = pl.BlockSpec((tm, D), lambda i: (i, 0))
        scratch_shapes = []
        dims = ("parallel",)
        weight_stream_bytes = 2 * D * H * 2

    if vmem_limit_bytes is None:
        vmem_limit_bytes = min(budget,
                               max(int(need * 1.4) + (2 << 20), 32 << 20))

    cost = pl.CostEstimate(
        flops=4 * M * D * H,                       # two matmuls: 2*M*D*H each
        transcendentals=M * H,                     # one tanh per hidden element
        bytes_accessed=(M * D * x_bytes            # x
                        + weight_stream_bytes      # W1 + W2 (bf16)
                        + (H + D) * 4              # biases
                        + M * D * out_bytes),      # output
    )

    out = pl.pallas_call(
        kernel,
        out_shape=jax.ShapeDtypeStruct((M, D), out_dtype),
        grid_spec=pltpu.PrefetchScalarGridSpec(
            num_scalar_prefetch=0,
            grid=grid,
            in_specs=in_specs,
            out_specs=out_specs,
            scratch_shapes=scratch_shapes,
        ),
        compiler_params=pltpu.CompilerParams(
            dimension_semantics=dims,
            vmem_limit_bytes=int(vmem_limit_bytes),
        ),
        cost_estimate=cost,
    )(x2d, w1, b1_2d, w2, b2_2d)

    return out.reshape(orig_shape)


# ---------------------------------------------------------------------------
# Deterministic parameter init (PyTorch nn.Linear style: U(-1/sqrt(fan_in), ..))
# ---------------------------------------------------------------------------
def init_params(key, dim, hidden_dim):
    k1, k2, k3, k4 = jax.random.split(key, 4)
    lim1 = 1.0 / math.sqrt(dim)
    lim2 = 1.0 / math.sqrt(hidden_dim)
    w1 = jax.random.uniform(k1, (dim, hidden_dim), jnp.float32, -lim1, lim1)
    b1 = jax.random.uniform(k2, (hidden_dim,), jnp.float32, -lim1, lim1)
    w2 = jax.random.uniform(k3, (hidden_dim, dim), jnp.float32, -lim2, lim2)
    b2 = jax.random.uniform(k4, (dim,), jnp.float32, -lim2, lim2)
    return w1, b1, w2, b2


def reference(x, w1, b1, w2, b2):
    h = x @ w1 + b1
    c = math.sqrt(2.0 / math.pi)
    h = 0.5 * h * (1.0 + jnp.tanh(c * (h + 0.044715 * h ** 3)))
    return h @ w2 + b2


if __name__ == "__main__":
    # NOTE: on v6e/v7x, prefer D/H that are 256-multiples to fill the 256x256
    # MXU; 128 is kept here for a small demo (optimal on v5e).
    DIM, HIDDEN = 128, 256

    key = jax.random.PRNGKey(0)
    kx1, kx2, kx3, kp = jax.random.split(key, 4)
    w1_f32, b1, w2_f32, b2 = init_params(kp, DIM, HIDDEN)

    # One-time bf16 conversion at init (not per call).
    w1 = w1_f32.astype(jnp.bfloat16)
    w2 = w2_f32.astype(jnp.bfloat16)
    # Reference uses the same bf16-rounded weight values (isolates accum error).
    w1_r = w1.astype(jnp.float32)
    w2_r = w2.astype(jnp.float32)

    # Case 1: tiny M (16 rows) -> single small tile.
    x_small = jax.random.normal(kx1, (2, 8, DIM), dtype=jnp.float32)
    y_small = jax.block_until_ready(mlp_block1(x_small, w1, b1, w2, b2))
    y_small_ref = reference(x_small, w1_r, b1, w2_r, b2)
    assert y_small.shape == x_small.shape
    assert jnp.allclose(y_small, y_small_ref, atol=3e-2, rtol=3e-2), \
        "small-case mismatch vs reference"

    # Case 2: ragged M (200 rows, not a multiple of the 128-row tile) ->
    # exercises the pad-less partial-last-tile path.
    x_rag = jax.random.normal(kx2, (200, DIM), dtype=jnp.float32)
    y_rag = jax.block_until_ready(mlp_block1(x_rag, w1, b1, w2, b2, tm=128))
    y_rag_ref = reference(x_rag, w1_r, b1, w2_r, b2)
    assert y_rag.shape == x_rag.shape
    assert jnp.allclose(y_rag, y_rag_ref, atol=3e-2, rtol=3e-2), \
        "ragged-M mismatch vs reference"

    # Case 3: multi-tile rows, resident-weight path (auto tm).
    x_big = jax.random.normal(kx3, (2, 256, DIM), dtype=jnp.float32)
    y_big = jax.block_until_ready(mlp_block1(x_big, w1, b1, w2, b2))
    y_big_ref = reference(x_big, w1_r, b1, w2_r, b2)
    assert y_big.shape == x_big.shape
    assert jnp.allclose(y_big, y_big_ref, atol=3e-2, rtol=3e-2), \
        "multi-tile mismatch vs reference"

    # Case 4: same input through the H-tiled reduction path (forced).
    y_ht = jax.block_until_ready(
        mlp_block1(x_big, w1, b1, w2, b2, force_h_tiling=True, th=128))
    assert y_ht.shape == x_big.shape
    assert jnp.allclose(y_ht, y_big_ref, atol=3e-2, rtol=3e-2), \
        "H-tiled mismatch vs reference"

    print("KERNEL_OK")
</pallas_src>

<mosaic_0001>
module attributes {stable_mosaic.version = 11 : i64} {
  func.func @_mlp_kernel_resident(%arg0: i32, %arg1: memref<16x128xf32, #tpu.memory_space<vmem>>, %arg2: memref<128x256xbf16, #tpu.memory_space<vmem>>, %arg3: memref<1x256xf32, #tpu.memory_space<vmem>>, %arg4: memref<256x128xbf16, #tpu.memory_space<vmem>>, %arg5: memref<1x128xf32, #tpu.memory_space<vmem>>, %arg6: memref<16x128xf32, #tpu.memory_space<vmem>>) attributes {dimension_semantics = [#tpu.dimension_semantics<parallel>], iteration_bounds = array<i64: 1>, scalar_prefetch = 0 : i64, scratch_operands = 0 : i64, tpu.core_type = #tpu.core_type<tc>, window_params = [{transform_indices = @transform_0, window_bounds = array<i64: 16, 128>}, {pipeline_mode = #tpu.pipeline_mode<synchronous>, transform_indices = @transform_1, window_bounds = array<i64: 128, 256>}, {pipeline_mode = #tpu.pipeline_mode<synchronous>, transform_indices = @transform_2, window_bounds = array<i64: 1, 256>}, {pipeline_mode = #tpu.pipeline_mode<synchronous>, transform_indices = @transform_3, window_bounds = array<i64: 256, 128>}, {pipeline_mode = #tpu.pipeline_mode<synchronous>, transform_indices = @transform_4, window_bounds = array<i64: 1, 128>}, {transform_indices = @transform_5, window_bounds = array<i64: 16, 128>}]} {
    %c0 = arith.constant 0 : index
    %c0_0 = arith.constant 0 : index
    %0 = vector.load %arg1[%c0, %c0_0] : memref<16x128xf32, #tpu.memory_space<vmem>>, vector<16x128xf32>
    %1 = arith.truncf %0 : vector<16x128xf32> to vector<16x128xbf16>
    %c0_1 = arith.constant 0 : index
    %c0_2 = arith.constant 0 : index
    %2 = vector.load %arg2[%c0_1, %c0_2] : memref<128x256xbf16, #tpu.memory_space<vmem>>, vector<128x256xbf16>
    %cst = arith.constant dense<0.000000e+00> : vector<16x256xf32>
    %3 = tpu.matmul %1, %2, %cst {dimension_numbers = #tpu.dot_dimension_numbers<[1], [0], [0], [1], [0, 0, 1, 1], [], []>} : vector<16x128xbf16>, vector<128x256xbf16>, vector<16x256xf32> -> vector<16x256xf32>
    %c0_3 = arith.constant 0 : index
    %c0_4 = arith.constant 0 : index
    %4 = vector.load %arg3[%c0_3, %c0_4] : memref<1x256xf32, #tpu.memory_space<vmem>>, vector<1x256xf32>
    %5 = vector.broadcast %4 : vector<1x256xf32> to vector<16x256xf32>
    %6 = arith.addf %3, %5 : vector<16x256xf32>
    %cst_5 = arith.constant 0.797884583 : f32
    %7 = vector.broadcast %cst_5 : f32 to vector<16x256xf32>
    %8 = arith.mulf %7, %6 : vector<16x256xf32>
    %9 = arith.mulf %6, %6 : vector<16x256xf32>
    %cst_6 = arith.constant 4.471500e-02 : f32
    %10 = vector.broadcast %cst_6 : f32 to vector<16x256xf32>
    %11 = arith.mulf %10, %9 : vector<16x256xf32>
    %cst_7 = arith.constant 1.000000e+00 : f32
    %12 = vector.broadcast %cst_7 : f32 to vector<16x256xf32>
    %13 = arith.addf %12, %11 : vector<16x256xf32>
    %14 = arith.mulf %8, %13 : vector<16x256xf32>
    %15 = math.tanh %14 : vector<16x256xf32>
    %cst_8 = arith.constant 5.000000e-01 : f32
    %16 = vector.broadcast %cst_8 : f32 to vector<16x256xf32>
    %17 = arith.mulf %16, %15 : vector<16x256xf32>
    %cst_9 = arith.constant 5.000000e-01 : f32
    %18 = vector.broadcast %cst_9 : f32 to vector<16x256xf32>
    %19 = arith.addf %18, %17 : vector<16x256xf32>
    %20 = arith.mulf %6, %19 : vector<16x256xf32>
    %21 = arith.truncf %20 : vector<16x256xf32> to vector<16x256xbf16>
    %c0_10 = arith.constant 0 : index
    %c0_11 = arith.constant 0 : index
    %22 = vector.load %arg4[%c0_10, %c0_11] : memref<256x128xbf16, #tpu.memory_space<vmem>>, vector<256x128xbf16>
    %cst_12 = arith.constant dense<0.000000e+00> : vector<16x128xf32>
    %23 = tpu.matmul %21, %22, %cst_12 {dimension_numbers = #tpu.dot_dimension_numbers<[1], [0], [0], [1], [0, 0, 1, 1], [], []>} : vector<16x256xbf16>, vector<256x128xbf16>, vector<16x128xf32> -> vector<16x128xf32>
    %c0_13 = arith.constant 0 : index
    %c0_14 = arith.constant 0 : index
    %24 = vector.load %arg5[%c0_13, %c0_14] : memref<1x128xf32, #tpu.memory_space<vmem>>, vector<1x128xf32>
    %25 = vector.broadcast %24 : vector<1x128xf32> to vector<16x128xf32>
    %26 = arith.addf %23, %25 : vector<16x128xf32>
    %c0_15 = arith.constant 0 : index
    %c0_16 = arith.constant 0 : index
    %27 = vector.load %arg6[%c0_15, %c0_16] : memref<16x128xf32, #tpu.memory_space<vmem>>, vector<16x128xf32>
    tpu.vector_store %arg6[%c0_15, %c0_16], %26 {strides = array<i32>} : memref<16x128xf32, #tpu.memory_space<vmem>>, vector<16x128xf32>,
    return
  }
  func.func @transform_0(%arg0: i32) -> (i32, i32) {
    %c0_i32 = arith.constant 0 : i32
    %c0_i32_0 = arith.constant 0 : i32
    return %arg0, %c0_i32 : i32, i32
  }
  func.func @transform_1(%arg0: i32) -> (i32, i32) {
    %c0_i32 = arith.constant 0 : i32
    %c0_i32_0 = arith.constant 0 : i32
    %c0_i32_1 = arith.constant 0 : i32
    return %c0_i32, %c0_i32_0 : i32, i32
  }
  func.func @transform_2(%arg0: i32) -> (i32, i32) {
    %c0_i32 = arith.constant 0 : i32
    %c0_i32_0 = arith.constant 0 : i32
    %c0_i32_1 = arith.constant 0 : i32
    return %c0_i32, %c0_i32_0 : i32, i32
  }
  func.func @transform_3(%arg0: i32) -> (i32, i32) {
    %c0_i32 = arith.constant 0 : i32
    %c0_i32_0 = arith.constant 0 : i32
    %c0_i32_1 = arith.constant 0 : i32
    return %c0_i32, %c0_i32_0 : i32, i32
  }
  func.func @transform_4(%arg0: i32) -> (i32, i32) {
    %c0_i32 = arith.constant 0 : i32
    %c0_i32_0 = arith.constant 0 : i32
    %c0_i32_1 = arith.constant 0 : i32
    return %c0_i32, %c0_i32_0 : i32, i32
  }
  func.func @transform_5(%arg0: i32) -> (i32, i32) {
    %c0_i32 = arith.constant 0 : i32
    %c0_i32_0 = arith.constant 0 : i32
    return %arg0, %c0_i32 : i32, i32
  }
}

</mosaic_0001>

<bundles_post_ra>
// kernel: tpu_custom_call.1
= control target key start
LH: loop header
LB: loop body
LE: loop exit
PB: predicated region body
PF: predicated region fallthrough
CT: control target
= control target key end

     0   :  { %10 = vsyncpa [#allocation3], 0  ;;  %s766_s0 = inlined_call_operand.hbm [shape: f32[16,128], index: 0, kind: input, shape index: {}]   ;;  %s767_s1 = inlined_call_operand.hbm [shape: bf16[128,256], index: 1, kind: input, shape index: {}]   ;;  %s768_s2 = inlined_call_operand.vmem [shape: f32[1,256], index: 2, kind: input, shape index: {}]   ;;  %s769_s3 = inlined_call_operand.hbm [shape: bf16[256,128], index: 3, kind: input, shape index: {}]   ;;  %s770_s4 = inlined_call_operand.vmem [shape: f32[1,128], index: 4, kind: input, shape index: {}]   ;;  %s771_s5 = inlined_call_operand.hbm [shape: f32[16,128], index: 5, kind: output, shape index: {}]  }
   0x1   :  { %11 = vsyncpa [#allocation6], 0 }
   0x2   :  { %12 = vsyncpa [#allocation4], 0  ;;  %s657_s18 = smov [#allocation5]   ;;  %s658_s20 = smov [#allocation2]  }
   0x3   :  { %s30_s19 = sshll.u32 %s657_s18, 4  ;;  %s18_s21 = sshll.u32 %s658_s20, 4  ;;  %s31_s19 = int_to_ptr.vmem [resolvable:$true] %s30_s19  ;;  %s696_s21 = int_to_ptr.vmem [resolvable:$true] %s18_s21 }
   0x4   :  { %s563_s24 = scalar_lea.hbm %s767_s1, 2048 }
   0x5   :  { %p564_p0 = scmp.ne.s32.totalorder %s767_s1, %s563_s24  ;;  %p567_p1 = scmp.lt.u32.totalorder %s563_s24, %s767_s1 }
   0x7   :  { %p569_p2 = pnand %p567_p1, %p564_p0 }
   0x9   :  { %572 = shalt.err (!%p569_p2)
}
   0xa   :  { %s573_s29 = scalar_lea.vmem %s31_s19, 2048  ;;  %p578_p4 = scmp.lt.s32.totalorder %s31_s19, %s31_s19 }
   0xb   :  { %p574_p3 = scmp.ne.s32.totalorder %s31_s19, %s573_s29  ;;  %p579_p5 = scmp.lt.s32.totalorder %s573_s29, %s573_s29 }
   0xd   :  { %p580_p6 = por %p579_p5, %p578_p4 }
   0xf   :  { %p581_p7 = pnand %p580_p6, %p574_p3 }
  0x11   :  { %584 = shalt.err (!%p581_p7)
}
  0x12   :  { %s659_s30 = smov 128   ;;  %s660_s6 = smov 8  }
  0x13   :  { %36 = dma.hbm_to_vmem [thread:$0]  %s767_s1, 2048, %s31_s19, [#allocation6], %s659_s30, %s659_s30, %s660_s6  }
  0x14   :  { %s585_s11 = scalar_lea.hbm %s766_s0, 256 }
  0x15   :  { %p586_p8 = scmp.ne.s32.totalorder %s766_s0, %s585_s11  ;;  %p589_p9 = scmp.lt.u32.totalorder %s585_s11, %s766_s0 }
  0x17   :  { %p591_p10 = pnand %p589_p9, %p586_p8 }
  0x19   :  { %594 = shalt.err (!%p591_p10)
}
  0x1a   :  { %s595_s16 = scalar_lea.vmem %s696_s21, 256  ;;  %p600_p12 = scmp.lt.s32.totalorder %s696_s21, %s696_s21 }
  0x1b   :  { %p596_p11 = scmp.ne.s32.totalorder %s696_s21, %s595_s16  ;;  %p601_p13 = scmp.lt.s32.totalorder %s595_s16, %s595_s16 }
  0x1d   :  { %p602_p0 = por %p601_p13, %p600_p12 }
  0x1f   :  { %p603_p1 = pnand %p602_p0, %p596_p11 }
  0x21   :  { %606 = shalt.err (!%p603_p1)
}
  0x22   :  { %24 = dma.hbm_to_vmem [thread:$0]  %s766_s0, 256, %s696_s21, [#allocation3], %s659_s30, %s659_s30, %s660_s6  }
  0x23   :  { %s661_s18 = smov [#allocation7]   ;;  %s607_s23 = scalar_lea.hbm %s769_s3, 2048 }
  0x24   :  { %s44_s19 = sshll.u32 %s661_s18, 4  ;;  %p608_p2 = scmp.ne.s32.totalorder %s769_s3, %s607_s23  ;;  %s45_s19 = int_to_ptr.vmem [resolvable:$true] %s44_s19 }
  0x25   :  { %p611_p3 = scmp.lt.u32.totalorder %s607_s23, %s769_s3 }
  0x27   :  { %p613_p4 = pnand %p611_p3, %p608_p2 }
  0x29   :  { %616 = shalt.err (!%p613_p4)
}
  0x2a   :  { %s617_s28 = scalar_lea.vmem %s45_s19, 2048  ;;  %p622_p6 = scmp.lt.s32.totalorder %s45_s19, %s45_s19 }
  0x2b   :  { %p618_p5 = scmp.ne.s32.totalorder %s45_s19, %s617_s28  ;;  %p623_p7 = scmp.lt.s32.totalorder %s617_s28, %s617_s28 }
  0x2d   :  { %p624_p8 = por %p623_p7, %p622_p6 }
  0x2f   :  { %p625_p9 = pnand %p624_p8, %p618_p5 }
  0x31   :  { %628 = shalt.err (!%p625_p9)
}
  0x32   :  { %s662_s0 = smov 64   ;;  %s663_s21 = smov 4  }
  0x33   :  { %50 = dma.hbm_to_vmem [thread:$0]  %s769_s3, 2048, %s45_s19, [#allocation6], %s662_s0, %s662_s0, %s663_s21  }
  0x34   :  { %651 = dma.done.wait [#allocation3], 256  }
  0x35   :  { %652 = vsyncadd [#allocation3], 4294967040 }
  0x36   :  { %653 = dma.done.wait [#allocation6], 4096  }
  0x37   :  { %654 = vsyncadd [#allocation6], 4294963200  ;;  %v664_v0 = vmov 0   ;;  %v515_v1 = vld [vmem:[#allocation5 + $0x4] ss:$8 sps:$4 sm:$0xff]   ;;  %v63_v17 = vld [vmem:[#allocation2] sm:$0xff]  ;;  %v84_v36 = vlaneseq }
  0x38   :  { %206 = vmatprep.mubr.bf16.mxu0 %v664_v0  ;;  %v517_v2 = vld [vmem:[#allocation5] ss:$8 sps:$4 sm:$0xff]   ;;  %174 = vmatprep.subr.bf16.mxu0 %v515_v1  ;;  %v518_v3 = vld [vmem:[#allocation5 + $0x14] ss:$8 sps:$4 sm:$0xff]   ;;  %v520_v4 = vld [vmem:[#allocation5 + $0x10] ss:$8 sps:$4 sm:$0xff]  }
  0x39   :  { %175 = vmatpush1.bf16.msra.mxu0 %v517_v2  ;;  %v521_v5 = vld [vmem:[#allocation5 + $0x24] ss:$8 sps:$4 sm:$0xff]   ;;  %v523_v6 = vld [vmem:[#allocation5 + $0x20] ss:$8 sps:$4 sm:$0xff]   ;;  %v524_v7 = vld [vmem:[#allocation5 + $0x34] ss:$8 sps:$4 sm:$0xff]  }
  0x3a   :  { %176 = vmatprep.subr.bf16.mxu0 %v518_v3  ;;  %v526_v8 = vld [vmem:[#allocation5 + $0x30] ss:$8 sps:$4 sm:$0xff]   ;;  %v527_v9 = vld [vmem:[#allocation5 + $0x44] ss:$8 sps:$4 sm:$0xff]   ;;  %v529_v10 = vld [vmem:[#allocation5 + $0x40] ss:$8 sps:$4 sm:$0xff]  }
  0x3b   :  { %v530_v11 = vld [vmem:[#allocation5 + $0x54] ss:$8 sps:$4 sm:$0xff]   ;;  %v532_v12 = vld [vmem:[#allocation5 + $0x50] ss:$8 sps:$4 sm:$0xff]   ;;  %v533_v13 = vld [vmem:[#allocation5 + $0x64] ss:$8 sps:$4 sm:$0xff]  }
  0x3c   :  { %v535_v14 = vld [vmem:[#allocation5 + $0x60] ss:$8 sps:$4 sm:$0xff]   ;;  %v536_v15 = vld [vmem:[#allocation5 + $0x74] ss:$8 sps:$4 sm:$0xff]   ;;  %v538_v16 = vld [vmem:[#allocation5 + $0x70] ss:$8 sps:$4 sm:$0xff]  }
  0x3d   :  { %177 = vmatpush1.bf16.msra.mxu0 %v520_v4  ;;  %v64_v18 = vld [vmem:[#allocation2 + $0x8] sm:$0xff]  ;;  %v539_v20 = vld [vmem:[#allocation7 + $0x40] sm:$0xff]   ;;  %v541_v22 = vld [vmem:[#allocation7 + $0x48] sm:$0xff]   ;;  %v85_v37 = vshrl.u32 %v84_v36, 7  ;;  %s665_s10 = smov [#allocation8]  }
  0x3e   :  { %178 = vmatprep.subr.bf16.mxu0 %v521_v5  ;;  %v65_v19 = vpack.c.bf16 %v64_v18, %v63_v17  ;;  %v540_v21 = vld [vmem:[#allocation7] sm:$0xff]   ;;  %484 = vmatprep.subr.bf16.mxu1 %v539_v20  ;;  %v542_v23 = vld [vmem:[#allocation7 + $0x8] sm:$0xff]   ;;  %v543_v24 = vld [vmem:[#allocation7 + $0x50] sm:$0xff]   ;;  %s438_s11 = sshll.u32 %s665_s10, 4  ;;  %s439_s11 = int_to_ptr.vmem [resolvable:$true] %s438_s11 }
  0x3f   :  { %485 = vmatpush3.bf16.msra.mxu1 %v540_v21  ;;  %v544_v25 = vld [vmem:[#allocation7 + $0x10] sm:$0xff]   ;;  %v545_v26 = vld [vmem:[#allocation7 + $0x58] sm:$0xff]   ;;  %v547_v28 = vld [vmem:[#allocation7 + $0x60] sm:$0xff]   ;;  %v86_v38 = vsub.s32 0, %v85_v37  ;;  %v90_v40 = vsub.s32 1, %v85_v37  ;;  %s629_s12 = scalar_lea.vmem %s439_s11, 256  ;;  %p634_p11 = scmp.lt.s32.totalorder %s439_s11, %s439_s11 }
  0x40   :  { %486 = vmatprep.subr.bf16.mxu1 %v541_v22  ;;  %v546_v27 = vld [vmem:[#allocation7 + $0x18] sm:$0xff]   ;;  %v548_v29 = vld [vmem:[#allocation7 + $0x20] sm:$0xff]   ;;  %v549_v30 = vld [vmem:[#allocation7 + $0x68] sm:$0xff]   ;;  %p630_p10 = scmp.ne.s32.totalorder %s439_s11, %s629_s12  ;;  %p635_p12 = scmp.lt.s32.totalorder %s629_s12, %s629_s12 }
  0x41   :  { %179 = vmatpush1.bf16.msra.mxu0 %v523_v6  ;;  %v550_v31 = vld [vmem:[#allocation7 + $0x28] sm:$0xff]   ;;  %v551_v32 = vld [vmem:[#allocation7 + $0x70] sm:$0xff]   ;;  %v553_v34 = vld [vmem:[#allocation7 + $0x78] sm:$0xff]  }
  0x42   :  { %180 = vmatprep.subr.bf16.mxu0 %v524_v7  ;;  %v552_v33 = vld [vmem:[#allocation7 + $0x30] sm:$0xff]   ;;  %v554_v35 = vld [vmem:[#allocation7 + $0x38] sm:$0xff]   ;;  %p636_p13 = por %p635_p12, %p634_p11 }
  0x43   :  { %487 = vmatpush3.bf16.msra.mxu1 %v542_v23  ;;  %v82_v39 = vld [vmem:[%s768_s2] sm:$0x3] }
  0x44   :  { %488 = vmatprep.subr.bf16.mxu1 %v543_v24  ;;  %v87_v41 = vrot.slane %v82_v39, %v86_v38  ;;  %v91_v42 = vrot.slane %v82_v39, %v90_v40  ;;  %p637_p0 = pnand %p636_p13, %p630_p10 }
  0x45   :  { %181 = vmatpush1.bf16.msra.mxu0 %v526_v8 }
  0x46   :  { %182 = vmatprep.subr.bf16.mxu0 %v527_v9 }
  0x47   :  { %489 = vmatpush3.bf16.msra.mxu1 %v544_v25 }
  0x48   :  { %490 = vmatprep.subr.bf16.mxu1 %v545_v26  ;;  %v467_v26 = vld [vmem:[%s770_s4] ss:$0 sm:$0xff] }
  0x49   :  { %183 = vmatpush1.bf16.msra.mxu0 %v529_v10 }
  0x4a   :  { %184 = vmatprep.subr.bf16.mxu0 %v530_v11 }
  0x4b   :  { %491 = vmatpush3.bf16.msra.mxu1 %v546_v27 }
  0x4c   :  { %492 = vmatprep.subr.bf16.mxu1 %v547_v28 }
  0x4d   :  { %185 = vmatpush1.bf16.msra.mxu0 %v532_v12 }
  0x4e   :  { %186 = vmatprep.subr.bf16.mxu0 %v533_v13 }
  0x4f   :  { %493 = vmatpush3.bf16.msra.mxu1 %v548_v29 }
  0x50   :  { %494 = vmatprep.subr.bf16.mxu1 %v549_v30 }
  0x51   :  { %187 = vmatpush1.bf16.msra.mxu0 %v535_v14 }
  0x52   :  { %188 = vmatprep.subr.bf16.mxu0 %v536_v15 }
  0x53   :  { %495 = vmatpush3.bf16.msra.mxu1 %v550_v31 }
  0x54   :  { %496 = vmatprep.subr.bf16.mxu1 %v551_v32 }
  0x55   :  { %189 = vmatpush1.bf16.msra.mxu0 %v538_v16 }
  0x57   :  { %497 = vmatpush3.bf16.msra.mxu1 %v552_v33 }
  0x58   :  { %207 = vmatmul.mubr.bf16.vlgmr.msra.gmra.mrb[0].mxu0 %v65_v19  ;;  %498 = vmatprep.subr.bf16.mxu1 %v553_v34 }
  0x5b   :  { %499 = vmatpush3.bf16.msra.mxu1 %v554_v35 }
 0x12b   :  { %v208_v43 = vpop.f32.mrb[0].mxu0 }
 0x12c   :  { %v209_v44 = vadd.f32 %v208_v43, %v87_v41  ;;  %v210_v45 = vpop.f32.mrb[1].mxu0 }
 0x12d   :  { %v211_v46 = vadd.f32 %v210_v45, %v91_v42  ;;  %v212_v47 = vpop.f32.mrb[2].mxu0 }
 0x12e   :  { %v221_v48 = vmul.f32 %v209_v44, %v209_v44  ;;  %v213_v49 = vadd.f32 %v212_v47, %v87_v41  ;;  %v214_v50 = vpop.f32.mrb[3].mxu0  ;;  %v217_v57 = vmul.f32 0.7978846, %v209_v44 }
 0x12f   :  { %v222_v51 = vmul.f32 %v211_v46, %v211_v46  ;;  %v215_v52 = vadd.f32 %v214_v50, %v91_v42  ;;  %v218_v60 = vmul.f32 0.7978846, %v211_v46 }
 0x130   :  { %v225_v53 = vmul.f32 0.044715, %v221_v48  ;;  %v223_v54 = vmul.f32 %v213_v49, %v213_v49  ;;  %v219_v0 = vmul.f32 0.7978846, %v213_v49 }
 0x131   :  { %v226_v55 = vmul.f32 0.044715, %v222_v51  ;;  %v224_v56 = vmul.f32 %v215_v52, %v215_v52  ;;  %v220_v3 = vmul.f32 0.7978846, %v215_v52 }
 0x132   :  { %v229_v58 = vadd.f32 1.0, %v225_v53  ;;  %v227_v59 = vmul.f32 0.044715, %v223_v54 }
 0x133   :  { %v230_v61 = vadd.f32 1.0, %v226_v55  ;;  %v228_v62 = vmul.f32 0.044715, %v224_v56 }
 0x134   :  { %v233_v63 = vmul.f32 %v229_v58, %v217_v57  ;;  %v231_v1 = vadd.f32 1.0, %v227_v59 }
 0x135   :  { %v234_v2 = vmul.f32 %v230_v61, %v218_v60  ;;  %v232_v4 = vadd.f32 1.0, %v228_v62 }
 0x136   :  { %555 = vtanh.f32 %v233_v63  ;;  %v235_v5 = vmul.f32 %v231_v1, %v219_v0 }
 0x137   :  { %v236_v6 = vmul.f32 %v232_v4, %v220_v3  ;;  %557 = vtanh.f32 %v234_v2 }
 0x138   :  { %559 = vtanh.f32 %v235_v5 }
 0x139   :  { %561 = vtanh.f32 %v236_v6 }
 0x140   :  { %v556_v7 = vpop.eup %555 }
 0x141   :  { %v558_v8 = vpop.eup %557  ;;  %v241_v9 = vmul.f32 0.5, %v556_v7 }
 0x142   :  { %v560_v10 = vpop.eup %559  ;;  %v242_v11 = vmul.f32 0.5, %v558_v8 }
 0x143   :  { %v562_v12 = vpop.eup %561  ;;  %v245_v13 = vadd.f32 0.5, %v241_v9  ;;  %v243_v14 = vmul.f32 0.5, %v560_v10 }
 0x144   :  { %v244_v15 = vmul.f32 0.5, %v562_v12  ;;  %v246_v16 = vadd.f32 0.5, %v242_v11 }
 0x145   :  { %v247_v17 = vadd.f32 0.5, %v243_v14  ;;  %v249_v19 = vmul.f32 %v245_v13, %v209_v44 }
 0x146   :  { %v248_v18 = vadd.f32 0.5, %v244_v15  ;;  %v250_v21 = vmul.f32 %v246_v16, %v211_v46 }
 0x147   :  { %v251_v20 = vmul.f32 %v247_v17, %v213_v49 }
 0x148   :  { %v252_v22 = vmul.f32 %v248_v18, %v215_v52 }
 0x149   :  { %v253_v23 = vpack.c.bf16 %v251_v20, %v249_v19 }
 0x14a   :  { %v254_v24 = vpack.c.bf16 %v252_v22, %v250_v21 }
 0x14c   :  { %422 = vmatprep.mubr.bf16.mxu1 %v254_v24 }
 0x14d   :  { %423 = vmatmul.mubr.bf16.vlgmr.msra.gmra.mrb[0].mxu1 %v253_v23 }
 0x220   :  { %v500_v25 = vpop.f32.mrb[0].mxu1 }
 0x221   :  { %v501_v27 = vpop.f32.mrb[1].mxu1 }
 0x222   :  { %v502_v28 = vadd.f32 %v501_v27, %v500_v25  ;;  %v503_v29 = vpop.f32.mrb[2].mxu1 }
 0x223   :  { %v504_v30 = vpop.f32.mrb[3].mxu1 }
 0x224   :  { %v425_v31 = vadd.f32 %v502_v28, %v467_v26  ;;  %v505_v32 = vadd.f32 %v504_v30, %v503_v29 }
 0x226   :  { %431 = vst [vmem:[#allocation8] sm:$0xff] %v425_v31  ;;  %v428_v33 = vadd.f32 %v505_v32, %v467_v26 }
 0x228   :  { %432 = vst [vmem:[#allocation8 + $0x8] sm:$0xff] %v428_v33 }
 0x229   :  { %640 = shalt.err (!%p637_p0)
}
 0x22a   :  { %s641_s14 = scalar_lea.hbm %s771_s5, 256 }
 0x22b   :  { %p642_p1 = scmp.ne.s32.totalorder %s771_s5, %s641_s14  ;;  %p645_p2 = scmp.lt.u32.totalorder %s641_s14, %s771_s5 }
 0x22d   :  { %p647_p3 = pnand %p645_p2, %p642_p1 }
 0x22f   :  { %650 = shalt.err (!%p647_p3)
}
 0x230   :  { %444 = dma.vmem_to_hbm [thread:$0]  %s439_s11, 256, %s771_s5, [#allocation4], %s659_s30, %s659_s30, %s660_s6  }
 0x231   :  { %655 = dma.done.wait [#allocation4], 256  }
 0x232   :  { %656 = vsyncadd [#allocation4], 4294967040 }
 0x233   :  { %448 = vsyncpa [#allocation3], 1 }
 0x234   :  { %449 = vsyncpa [#allocation6], 1 }
 0x235   :  { %450 = vsyncpa [#allocation4], 1 }

</bundles_post_ra>
